<compile_context>
chip_gen: v7x
topology: tpu7x:2x2x1
jax: 0.10.0
libtpu: 0.0.40
codegen_flags: <defaults>
</compile_context>

<pallas_src>
import jax
import jax.numpy as jnp
from jax.experimental import pallas as pl
from jax.experimental.pallas import tpu as pltpu


def _round_up(x, m):
    return (x + m - 1) // m * m


def _fnn_kernel(idx_ref, emb_ref, w1_ref, b1_ref, w2_ref, b2_ref, out_ref):
    # idx_ref: (TB, S) int32     emb_ref: (Vp, Dp) bf16
    # w1_ref : (Dp, Hp) bf16     b1_ref : (1, Hp) f32
    # w2_ref : (Hp, Cp) bf16     b2_ref : (1, Cp) f32    out_ref: (TB, Cp) f32
    tb, seq = idx_ref.shape
    vp = emb_ref.shape[0]

    # Build per-row token counts on-chip; the frozen-embedding gather + mean
    # over the sequence then collapses into one MXU matmul + scalar rescale.
    ids = idx_ref[...]                                          # (TB, S) int32
    lane_id = jax.lax.broadcasted_iota(jnp.int32, (tb, vp), 1)  # (TB, Vp)
    counts = jnp.zeros((tb, vp), jnp.float32)
    # seq is static; short unrolled loop of VPU compare-and-add.
    # TODO(synk): switch to a fori_loop / seq-tiled variant for very long S.
    for t in range(seq):
        counts = counts + (lane_id == ids[:, t:t + 1]).astype(jnp.float32)

    # bf16 is exact for integer counts <= 256 (any S <= 256).
    summed = jnp.dot(counts.astype(jnp.bfloat16), emb_ref[...],
                     preferred_element_type=jnp.float32)        # (TB, Dp)
    avg = summed * (1.0 / seq)                                  # mean over seq

    h = jnp.dot(avg.astype(jnp.bfloat16), w1_ref[...],
                preferred_element_type=jnp.float32) + b1_ref[...]  # (TB, Hp)
    h = jnp.maximum(h, 0.0)                                        # ReLU

    out = jnp.dot(h.astype(jnp.bfloat16), w2_ref[...],
                  preferred_element_type=jnp.float32) + b2_ref[...]  # (TB, Cp)
    out_ref[...] = out.astype(out_ref.dtype)


def _vmem_limit_bytes():
    try:
        cap = int(pltpu.get_tpu_info().vmem_capacity_bytes)
    except Exception:
        cap = 64 << 20                      # conservative (v7x-sized) default
    # ~3/4 of physical, capped at 96 MiB: 96 MiB on v5e/v6e, 48 MiB on v7x.
    return max(16 << 20, min(cap * 3 // 4, 96 << 20))


def make_fnn_forward(embeddings, w1, b1, w2, b2):
    """Pad/cast parameters once; return a jitted forward(x_idx) -> (B, C)."""
    V, D = embeddings.shape
    H = w1.shape[1]
    C = w2.shape[1]

    # Lane-dense padded feature sizes (multiples of 128).
    Vp = _round_up(V, 128)
    Dp = _round_up(D, 128)
    Hp = _round_up(H, 128)
    Cp = _round_up(C, 128)

    # Hoisted out of the per-call path: built exactly once (embedding frozen).
    emb_p = jnp.zeros((Vp, Dp), jnp.bfloat16).at[:V, :D].set(
        embeddings.astype(jnp.bfloat16))
    w1_p = jnp.zeros((Dp, Hp), jnp.bfloat16).at[:D, :H].set(
        w1.astype(jnp.bfloat16))
    w2_p = jnp.zeros((Hp, Cp), jnp.bfloat16).at[:H, :C].set(
        w2.astype(jnp.bfloat16))
    b1_p = jnp.zeros((1, Hp), jnp.float32).at[0, :H].set(b1.astype(jnp.float32))
    b2_p = jnp.zeros((1, Cp), jnp.float32).at[0, :C].set(b2.astype(jnp.float32))

    vmem_limit = _vmem_limit_bytes()

    def _build(single_buffer_resident):
        n_buf_res = 1 if single_buffer_resident else 2

        def resident_spec(shape):
            # Grid-invariant operands: constant index_map; single-buffered when
            # supported (halves their VMEM footprint, frees room for bigger TB).
            if single_buffer_resident:
                return pl.BlockSpec(shape, lambda i: (0,) * len(shape),
                                    pipeline_mode=pl.Buffered(1))
            return pl.BlockSpec(shape, lambda i: (0,) * len(shape))

        @jax.jit
        def forward(x_idx):
            B, S = x_idx.shape
            Bp = _round_up(B, 8)

            # Explicit VMEM accounting (bytes).
            resident_bytes = (n_buf_res * 2 * (Vp * Dp + Dp * Hp + Hp * Cp)
                              + n_buf_res * 4 * (Hp + Cp))
            per_row_bytes = (2 * S * 4          # ids tile, double-buffered
                             + 2 * Cp * 4       # out tile, double-buffered
                             + Vp * (4 + 2)     # in-kernel counts f32 + bf16
                             + Dp * (4 + 2) + Hp * (4 + 2) + Cp * 4)
            # TODO(synk): if resident_bytes alone blows the budget (vocab-scale
            # tables, esp. v7x), add a second "arbitrary" grid axis tiling Vp
            # (the K-dim of counts@emb) with an f32 VMEM accumulator.
            budget = vmem_limit - resident_bytes - (4 << 20)     # slack
            tb_cap = max(8, budget // max(per_row_bytes, 1))
            TB = int(min(tb_cap, Bp, 2048))
            if TB >= 256:
                TB = TB // 256 * 256            # MXU-friendly M on v6e/v7x
            else:
                TB = max(8, TB // 8 * 8)
            Bp = _round_up(Bp, TB)
            # Prefer >= 2 batch tiles so the parallel axis can shard across
            # v7x's two TensorCores (only when each half keeps MXU-sized M).
            if Bp // TB < 2 and Bp >= 512:
                TB = max(256, (Bp // 2) // 256 * 256)
                Bp = _round_up(Bp, TB)

            x_p = jnp.zeros((Bp, S), jnp.int32).at[:B, :].set(
                x_idx.astype(jnp.int32))

            flops = 2 * Bp * (Vp * Dp + Dp * Hp + Hp * Cp)
            bytes_accessed = (Bp * S * 4 + Bp * Cp * 4
                              + 2 * (Vp * Dp + Dp * Hp + Hp * Cp)
                              + 4 * (Hp + Cp))

            out_p = pl.pallas_call(
                _fnn_kernel,
                out_shape=jax.ShapeDtypeStruct((Bp, Cp), jnp.float32),
                grid=(Bp // TB,),
                in_specs=[
                    pl.BlockSpec((TB, S), lambda i: (i, 0)),   # token ids
                    resident_spec((Vp, Dp)),                   # embeddings
                    resident_spec((Dp, Hp)),                   # w1
                    resident_spec((1, Hp)),                    # b1
                    resident_spec((Hp, Cp)),                   # w2
                    resident_spec((1, Cp)),                    # b2
                ],
                out_specs=pl.BlockSpec((TB, Cp), lambda i: (i, 0)),
                compiler_params=pltpu.CompilerParams(
                    dimension_semantics=("parallel",),         # megacore-shardable
                    vmem_limit_bytes=vmem_limit),
                cost_estimate=pl.CostEstimate(
                    flops=flops, transcendentals=0,
                    bytes_accessed=bytes_accessed),
            )(x_p, emb_p, w1_p, b1_p, w2_p, b2_p)

            return out_p[:B, :C]

        return forward

    state = {"fn": None}

    def forward(x_idx):
        if state["fn"] is None:
            try:
                fn = _build(True)                 # single-buffered residents
                out = fn(x_idx)
                state["fn"] = fn
                return out
            except Exception:
                state["fn"] = _build(False)       # fall back: default buffering
        return state["fn"](x_idx)

    return forward


if __name__ == "__main__":
    # Small shapes consistent with the module's forward:
    #   x: (batch=2, seq=8) int token ids; embeddings: (vocab=50, dim=32)
    #   h_size=64, num_classes=1 (module default).
    B, S = 2, 8
    VOCAB, D = 50, 32
    H, C = 64, 1

    key = jax.random.PRNGKey(0)
    k_emb, k_idx, k_w1, k_b1, k_w2, k_b2 = jax.random.split(key, 6)

    embeddings = jax.random.normal(k_emb, (VOCAB, D), dtype=jnp.float32)
    x_idx = jax.random.randint(k_idx, (B, S), 0, VOCAB, dtype=jnp.int32)

    # Deterministic synthetic parameters (stored as (in, out)).
    w1 = jax.random.normal(k_w1, (D, H), dtype=jnp.float32) * 0.1
    b1 = jax.random.normal(k_b1, (H,), dtype=jnp.float32) * 0.1
    w2 = jax.random.normal(k_w2, (H, C), dtype=jnp.float32) * 0.1
    b2 = jax.random.normal(k_b2, (C,), dtype=jnp.float32) * 0.1

    forward = make_fnn_forward(embeddings, w1, b1, w2, b2)
    out = jax.block_until_ready(forward(x_idx))

    # Pure-JAX f32 reference (PyTorch forward semantics).
    ref = jnp.take(embeddings, x_idx, axis=0).mean(axis=1)
    ref = jnp.maximum(ref @ w1 + b1, 0.0) @ w2 + b2

    assert out.shape == (B, C), out.shape
    # bf16 MXU operands -> modest tolerance vs the pure-f32 reference.
    assert jnp.allclose(out, ref, atol=3e-2, rtol=3e-2), (out, ref)

    print("KERNEL_OK")
</pallas_src>

<mosaic_0001>
module attributes {stable_mosaic.version = 11 : i64} {
  func.func @_fnn_kernel(%arg0: i32, %arg1: memref<8x8xi32, #tpu.memory_space<vmem>>, %arg2: memref<128x128xbf16, #tpu.memory_space<vmem>>, %arg3: memref<128x128xbf16, #tpu.memory_space<vmem>>, %arg4: memref<1x128xf32, #tpu.memory_space<vmem>>, %arg5: memref<128x128xbf16, #tpu.memory_space<vmem>>, %arg6: memref<1x128xf32, #tpu.memory_space<vmem>>, %arg7: memref<8x128xf32, #tpu.memory_space<vmem>>) attributes {dimension_semantics = [#tpu.dimension_semantics<parallel>], iteration_bounds = array<i64: 1>, scalar_prefetch = 0 : i64, scratch_operands = 0 : i64, tpu.core_type = #tpu.core_type<tc>, window_params = [{transform_indices = @transform_0, window_bounds = array<i64: 8, 8>}, {pipeline_mode = #tpu.pipeline_mode<synchronous>, transform_indices = @transform_1, window_bounds = array<i64: 128, 128>}, {pipeline_mode = #tpu.pipeline_mode<synchronous>, transform_indices = @transform_2, window_bounds = array<i64: 128, 128>}, {pipeline_mode = #tpu.pipeline_mode<synchronous>, transform_indices = @transform_3, window_bounds = array<i64: 1, 128>}, {pipeline_mode = #tpu.pipeline_mode<synchronous>, transform_indices = @transform_4, window_bounds = array<i64: 128, 128>}, {pipeline_mode = #tpu.pipeline_mode<synchronous>, transform_indices = @transform_5, window_bounds = array<i64: 1, 128>}, {transform_indices = @transform_6, window_bounds = array<i64: 8, 128>}]} {
    %c0 = arith.constant 0 : index
    %c0_0 = arith.constant 0 : index
    %0 = vector.load %arg1[%c0, %c0_0] : memref<8x8xi32, #tpu.memory_space<vmem>>, vector<8x8xi32>
    %1 = tpu.iota {dimensions = array<i32: 1>} : vector<8x128xi32>
    %cst = arith.constant 0.000000e+00 : f32
    %2 = vector.broadcast %cst : f32 to vector<8x128xf32>
    %3 = vector.extract_strided_slice %0 {offsets = [0, 0], sizes = [8, 1], strides = [1, 1]} : vector<8x8xi32> to vector<8x1xi32>
    %4 = vector.broadcast %3 : vector<8x1xi32> to vector<8x128xi32>
    %5 = arith.cmpi eq, %1, %4 : vector<8x128xi32>
    %6 = arith.extui %5 : vector<8x128xi1> to vector<8x128xi32>
    %7 = arith.sitofp %6 : vector<8x128xi32> to vector<8x128xf32>
    %8 = arith.addf %2, %7 : vector<8x128xf32>
    %9 = vector.extract_strided_slice %0 {offsets = [0, 1], sizes = [8, 1], strides = [1, 1]} : vector<8x8xi32> to vector<8x1xi32>
    %10 = vector.broadcast %9 : vector<8x1xi32> to vector<8x128xi32>
    %11 = arith.cmpi eq, %1, %10 : vector<8x128xi32>
    %12 = arith.extui %11 : vector<8x128xi1> to vector<8x128xi32>
    %13 = arith.sitofp %12 : vector<8x128xi32> to vector<8x128xf32>
    %14 = arith.addf %8, %13 : vector<8x128xf32>
    %15 = vector.extract_strided_slice %0 {offsets = [0, 2], sizes = [8, 1], strides = [1, 1]} : vector<8x8xi32> to vector<8x1xi32>
    %16 = vector.broadcast %15 : vector<8x1xi32> to vector<8x128xi32>
    %17 = arith.cmpi eq, %1, %16 : vector<8x128xi32>
    %18 = arith.extui %17 : vector<8x128xi1> to vector<8x128xi32>
    %19 = arith.sitofp %18 : vector<8x128xi32> to vector<8x128xf32>
    %20 = arith.addf %14, %19 : vector<8x128xf32>
    %21 = vector.extract_strided_slice %0 {offsets = [0, 3], sizes = [8, 1], strides = [1, 1]} : vector<8x8xi32> to vector<8x1xi32>
    %22 = vector.broadcast %21 : vector<8x1xi32> to vector<8x128xi32>
    %23 = arith.cmpi eq, %1, %22 : vector<8x128xi32>
    %24 = arith.extui %23 : vector<8x128xi1> to vector<8x128xi32>
    %25 = arith.sitofp %24 : vector<8x128xi32> to vector<8x128xf32>
    %26 = arith.addf %20, %25 : vector<8x128xf32>
    %27 = vector.extract_strided_slice %0 {offsets = [0, 4], sizes = [8, 1], strides = [1, 1]} : vector<8x8xi32> to vector<8x1xi32>
    %28 = vector.broadcast %27 : vector<8x1xi32> to vector<8x128xi32>
    %29 = arith.cmpi eq, %1, %28 : vector<8x128xi32>
    %30 = arith.extui %29 : vector<8x128xi1> to vector<8x128xi32>
    %31 = arith.sitofp %30 : vector<8x128xi32> to vector<8x128xf32>
    %32 = arith.addf %26, %31 : vector<8x128xf32>
    %33 = vector.extract_strided_slice %0 {offsets = [0, 5], sizes = [8, 1], strides = [1, 1]} : vector<8x8xi32> to vector<8x1xi32>
    %34 = vector.broadcast %33 : vector<8x1xi32> to vector<8x128xi32>
    %35 = arith.cmpi eq, %1, %34 : vector<8x128xi32>
    %36 = arith.extui %35 : vector<8x128xi1> to vector<8x128xi32>
    %37 = arith.sitofp %36 : vector<8x128xi32> to vector<8x128xf32>
    %38 = arith.addf %32, %37 : vector<8x128xf32>
    %39 = vector.extract_strided_slice %0 {offsets = [0, 6], sizes = [8, 1], strides = [1, 1]} : vector<8x8xi32> to vector<8x1xi32>
    %40 = vector.broadcast %39 : vector<8x1xi32> to vector<8x128xi32>
    %41 = arith.cmpi eq, %1, %40 : vector<8x128xi32>
    %42 = arith.extui %41 : vector<8x128xi1> to vector<8x128xi32>
    %43 = arith.sitofp %42 : vector<8x128xi32> to vector<8x128xf32>
    %44 = arith.addf %38, %43 : vector<8x128xf32>
    %45 = vector.extract_strided_slice %0 {offsets = [0, 7], sizes = [8, 1], strides = [1, 1]} : vector<8x8xi32> to vector<8x1xi32>
    %46 = vector.broadcast %45 : vector<8x1xi32> to vector<8x128xi32>
    %47 = arith.cmpi eq, %1, %46 : vector<8x128xi32>
    %48 = arith.extui %47 : vector<8x128xi1> to vector<8x128xi32>
    %49 = arith.sitofp %48 : vector<8x128xi32> to vector<8x128xf32>
    %50 = arith.addf %44, %49 : vector<8x128xf32>
    %51 = arith.truncf %50 : vector<8x128xf32> to vector<8x128xbf16>
    %c0_1 = arith.constant 0 : index
    %c0_2 = arith.constant 0 : index
    %52 = vector.load %arg2[%c0_1, %c0_2] : memref<128x128xbf16, #tpu.memory_space<vmem>>, vector<128x128xbf16>
    %cst_3 = arith.constant dense<0.000000e+00> : vector<8x128xf32>
    %53 = tpu.matmul %51, %52, %cst_3 {dimension_numbers = #tpu.dot_dimension_numbers<[1], [0], [0], [1], [0, 0, 1, 1], [], []>} : vector<8x128xbf16>, vector<128x128xbf16>, vector<8x128xf32> -> vector<8x128xf32>
    %cst_4 = arith.constant 1.250000e-01 : f32
    %54 = vector.broadcast %cst_4 : f32 to vector<8x128xf32>
    %55 = arith.mulf %53, %54 : vector<8x128xf32>
    %56 = arith.truncf %55 : vector<8x128xf32> to vector<8x128xbf16>
    %c0_5 = arith.constant 0 : index
    %c0_6 = arith.constant 0 : index
    %57 = vector.load %arg3[%c0_5, %c0_6] : memref<128x128xbf16, #tpu.memory_space<vmem>>, vector<128x128xbf16>
    %cst_7 = arith.constant dense<0.000000e+00> : vector<8x128xf32>
    %58 = tpu.matmul %56, %57, %cst_7 {dimension_numbers = #tpu.dot_dimension_numbers<[1], [0], [0], [1], [0, 0, 1, 1], [], []>} : vector<8x128xbf16>, vector<128x128xbf16>, vector<8x128xf32> -> vector<8x128xf32>
    %c0_8 = arith.constant 0 : index
    %c0_9 = arith.constant 0 : index
    %59 = vector.load %arg4[%c0_8, %c0_9] : memref<1x128xf32, #tpu.memory_space<vmem>>, vector<1x128xf32>
    %60 = vector.broadcast %59 : vector<1x128xf32> to vector<8x128xf32>
    %61 = arith.addf %58, %60 : vector<8x128xf32>
    %cst_10 = arith.constant 0.000000e+00 : f32
    %62 = vector.broadcast %cst_10 : f32 to vector<8x128xf32>
    %63 = arith.maximumf %61, %62 : vector<8x128xf32>
    %64 = arith.truncf %63 : vector<8x128xf32> to vector<8x128xbf16>
    %c0_11 = arith.constant 0 : index
    %c0_12 = arith.constant 0 : index
    %65 = vector.load %arg5[%c0_11, %c0_12] : memref<128x128xbf16, #tpu.memory_space<vmem>>, vector<128x128xbf16>
    %cst_13 = arith.constant dense<0.000000e+00> : vector<8x128xf32>
    %66 = tpu.matmul %64, %65, %cst_13 {dimension_numbers = #tpu.dot_dimension_numbers<[1], [0], [0], [1], [0, 0, 1, 1], [], []>} : vector<8x128xbf16>, vector<128x128xbf16>, vector<8x128xf32> -> vector<8x128xf32>
    %c0_14 = arith.constant 0 : index
    %c0_15 = arith.constant 0 : index
    %67 = vector.load %arg6[%c0_14, %c0_15] : memref<1x128xf32, #tpu.memory_space<vmem>>, vector<1x128xf32>
    %68 = vector.broadcast %67 : vector<1x128xf32> to vector<8x128xf32>
    %69 = arith.addf %66, %68 : vector<8x128xf32>
    %c0_16 = arith.constant 0 : index
    %c0_17 = arith.constant 0 : index
    %70 = vector.load %arg7[%c0_16, %c0_17] : memref<8x128xf32, #tpu.memory_space<vmem>>, vector<8x128xf32>
    tpu.vector_store %arg7[%c0_16, %c0_17], %69 {strides = array<i32>} : memref<8x128xf32, #tpu.memory_space<vmem>>, vector<8x128xf32>,
    return
  }
  func.func @transform_0(%arg0: i32) -> (i32, i32) {
    %c0_i32 = arith.constant 0 : i32
    %c0_i32_0 = arith.constant 0 : i32
    return %arg0, %c0_i32 : i32, i32
  }
  func.func @transform_1(%arg0: i32) -> (i32, i32) {
    %c0_i32 = arith.constant 0 : i32
    %c0_i32_0 = arith.constant 0 : i32
    %c0_i32_1 = arith.constant 0 : i32
    return %c0_i32, %c0_i32_0 : i32, i32
  }
  func.func @transform_2(%arg0: i32) -> (i32, i32) {
    %c0_i32 = arith.constant 0 : i32
    %c0_i32_0 = arith.constant 0 : i32
    %c0_i32_1 = arith.constant 0 : i32
    return %c0_i32, %c0_i32_0 : i32, i32
  }
  func.func @transform_3(%arg0: i32) -> (i32, i32) {
    %c0_i32 = arith.constant 0 : i32
    %c0_i32_0 = arith.constant 0 : i32
    %c0_i32_1 = arith.constant 0 : i32
    return %c0_i32, %c0_i32_0 : i32, i32
  }
  func.func @transform_4(%arg0: i32) -> (i32, i32) {
    %c0_i32 = arith.constant 0 : i32
    %c0_i32_0 = arith.constant 0 : i32
    %c0_i32_1 = arith.constant 0 : i32
    return %c0_i32, %c0_i32_0 : i32, i32
  }
  func.func @transform_5(%arg0: i32) -> (i32, i32) {
    %c0_i32 = arith.constant 0 : i32
    %c0_i32_0 = arith.constant 0 : i32
    %c0_i32_1 = arith.constant 0 : i32
    return %c0_i32, %c0_i32_0 : i32, i32
  }
  func.func @transform_6(%arg0: i32) -> (i32, i32) {
    %c0_i32 = arith.constant 0 : i32
    %c0_i32_0 = arith.constant 0 : i32
    return %arg0, %c0_i32 : i32, i32
  }
}

module attributes {stable_mosaic.version = 11 : i64} {
  func.func @_fnn_kernel(%arg0: i32, %arg1: memref<8x8xi32, #tpu.memory_space<vmem>>, %arg2: memref<128x128xbf16, #tpu.memory_space<vmem>>, %arg3: memref<128x128xbf16, #tpu.memory_space<vmem>>, %arg4: memref<1x128xf32, #tpu.memory_space<vmem>>, %arg5: memref<128x128xbf16, #tpu.memory_space<vmem>>, %arg6: memref<1x128xf32, #tpu.memory_space<vmem>>, %arg7: memref<8x128xf32, #tpu.memory_space<vmem>>) attributes {dimension_semantics = [#tpu.dimension_semantics<parallel>], iteration_bounds = array<i64: 1>, scalar_prefetch = 0 : i64, scratch_operands = 0 : i64, tpu.core_type = #tpu.core_type<tc>, window_params = [{transform_indices = @transform_0, window_bounds = array<i64: 8, 8>}, {pipeline_mode = #tpu.pipeline_mode<synchronous>, transform_indices = @transform_1, window_bounds = array<i64: 128, 128>}, {pipeline_mode = #tpu.pipeline_mode<synchronous>, transform_indices = @transform_2, window_bounds = array<i64: 128, 128>}, {pipeline_mode = #tpu.pipeline_mode<synchronous>, transform_indices = @transform_3, window_bounds = array<i64: 1, 128>}, {pipeline_mode = #tpu.pipeline_mode<synchronous>, transform_indices = @transform_4, window_bounds = array<i64: 128, 128>}, {pipeline_mode = #tpu.pipeline_mode<synchronous>, transform_indices = @transform_5, window_bounds = array<i64: 1, 128>}, {transform_indices = @transform_6, window_bounds = array<i64: 8, 128>}]} {
    %c0 = arith.constant 0 : index
    %c0_0 = arith.constant 0 : index
    %0 = vector.load %arg1[%c0, %c0_0] : memref<8x8xi32, #tpu.memory_space<vmem>>, vector<8x8xi32>
    %1 = tpu.iota {dimensions = array<i32: 1>} : vector<8x128xi32>
    %cst = arith.constant 0.000000e+00 : f32
    %2 = vector.broadcast %cst : f32 to vector<8x128xf32>
    %3 = vector.extract_strided_slice %0 {offsets = [0, 0], sizes = [8, 1], strides = [1, 1]} : vector<8x8xi32> to vector<8x1xi32>
    %4 = vector.broadcast %3 : vector<8x1xi32> to vector<8x128xi32>
    %5 = arith.cmpi eq, %1, %4 : vector<8x128xi32>
    %6 = arith.extui %5 : vector<8x128xi1> to vector<8x128xi32>
    %7 = arith.sitofp %6 : vector<8x128xi32> to vector<8x128xf32>
    %8 = arith.addf %2, %7 : vector<8x128xf32>
    %9 = vector.extract_strided_slice %0 {offsets = [0, 1], sizes = [8, 1], strides = [1, 1]} : vector<8x8xi32> to vector<8x1xi32>
    %10 = vector.broadcast %9 : vector<8x1xi32> to vector<8x128xi32>
    %11 = arith.cmpi eq, %1, %10 : vector<8x128xi32>
    %12 = arith.extui %11 : vector<8x128xi1> to vector<8x128xi32>
    %13 = arith.sitofp %12 : vector<8x128xi32> to vector<8x128xf32>
    %14 = arith.addf %8, %13 : vector<8x128xf32>
    %15 = vector.extract_strided_slice %0 {offsets = [0, 2], sizes = [8, 1], strides = [1, 1]} : vector<8x8xi32> to vector<8x1xi32>
    %16 = vector.broadcast %15 : vector<8x1xi32> to vector<8x128xi32>
    %17 = arith.cmpi eq, %1, %16 : vector<8x128xi32>
    %18 = arith.extui %17 : vector<8x128xi1> to vector<8x128xi32>
    %19 = arith.sitofp %18 : vector<8x128xi32> to vector<8x128xf32>
    %20 = arith.addf %14, %19 : vector<8x128xf32>
    %21 = vector.extract_strided_slice %0 {offsets = [0, 3], sizes = [8, 1], strides = [1, 1]} : vector<8x8xi32> to vector<8x1xi32>
    %22 = vector.broadcast %21 : vector<8x1xi32> to vector<8x128xi32>
    %23 = arith.cmpi eq, %1, %22 : vector<8x128xi32>
    %24 = arith.extui %23 : vector<8x128xi1> to vector<8x128xi32>
    %25 = arith.sitofp %24 : vector<8x128xi32> to vector<8x128xf32>
    %26 = arith.addf %20, %25 : vector<8x128xf32>
    %27 = vector.extract_strided_slice %0 {offsets = [0, 4], sizes = [8, 1], strides = [1, 1]} : vector<8x8xi32> to vector<8x1xi32>
    %28 = vector.broadcast %27 : vector<8x1xi32> to vector<8x128xi32>
    %29 = arith.cmpi eq, %1, %28 : vector<8x128xi32>
    %30 = arith.extui %29 : vector<8x128xi1> to vector<8x128xi32>
    %31 = arith.sitofp %30 : vector<8x128xi32> to vector<8x128xf32>
    %32 = arith.addf %26, %31 : vector<8x128xf32>
    %33 = vector.extract_strided_slice %0 {offsets = [0, 5], sizes = [8, 1], strides = [1, 1]} : vector<8x8xi32> to vector<8x1xi32>
    %34 = vector.broadcast %33 : vector<8x1xi32> to vector<8x128xi32>
    %35 = arith.cmpi eq, %1, %34 : vector<8x128xi32>
    %36 = arith.extui %35 : vector<8x128xi1> to vector<8x128xi32>
    %37 = arith.sitofp %36 : vector<8x128xi32> to vector<8x128xf32>
    %38 = arith.addf %32, %37 : vector<8x128xf32>
    %39 = vector.extract_strided_slice %0 {offsets = [0, 6], sizes = [8, 1], strides = [1, 1]} : vector<8x8xi32> to vector<8x1xi32>
    %40 = vector.broadcast %39 : vector<8x1xi32> to vector<8x128xi32>
    %41 = arith.cmpi eq, %1, %40 : vector<8x128xi32>
    %42 = arith.extui %41 : vector<8x128xi1> to vector<8x128xi32>
    %43 = arith.sitofp %42 : vector<8x128xi32> to vector<8x128xf32>
    %44 = arith.addf %38, %43 : vector<8x128xf32>
    %45 = vector.extract_strided_slice %0 {offsets = [0, 7], sizes = [8, 1], strides = [1, 1]} : vector<8x8xi32> to vector<8x1xi32>
    %46 = vector.broadcast %45 : vector<8x1xi32> to vector<8x128xi32>
    %47 = arith.cmpi eq, %1, %46 : vector<8x128xi32>
    %48 = arith.extui %47 : vector<8x128xi1> to vector<8x128xi32>
    %49 = arith.sitofp %48 : vector<8x128xi32> to vector<8x128xf32>
    %50 = arith.addf %44, %49 : vector<8x128xf32>
    %51 = arith.truncf %50 : vector<8x128xf32> to vector<8x128xbf16>
    %c0_1 = arith.constant 0 : index
    %c0_2 = arith.constant 0 : index
    %52 = vector.load %arg2[%c0_1, %c0_2] : memref<128x128xbf16, #tpu.memory_space<vmem>>, vector<128x128xbf16>
    %cst_3 = arith.constant dense<0.000000e+00> : vector<8x128xf32>
    %53 = tpu.matmul %51, %52, %cst_3 {dimension_numbers = #tpu.dot_dimension_numbers<[1], [0], [0], [1], [0, 0, 1, 1], [], []>} : vector<8x128xbf16>, vector<128x128xbf16>, vector<8x128xf32> -> vector<8x128xf32>
    %cst_4 = arith.constant 1.250000e-01 : f32
    %54 = vector.broadcast %cst_4 : f32 to vector<8x128xf32>
    %55 = arith.mulf %53, %54 : vector<8x128xf32>
    %56 = arith.truncf %55 : vector<8x128xf32> to vector<8x128xbf16>
    %c0_5 = arith.constant 0 : index
    %c0_6 = arith.constant 0 : index
    %57 = vector.load %arg3[%c0_5, %c0_6] : memref<128x128xbf16, #tpu.memory_space<vmem>>, vector<128x128xbf16>
    %cst_7 = arith.constant dense<0.000000e+00> : vector<8x128xf32>
    %58 = tpu.matmul %56, %57, %cst_7 {dimension_numbers = #tpu.dot_dimension_numbers<[1], [0], [0], [1], [0, 0, 1, 1], [], []>} : vector<8x128xbf16>, vector<128x128xbf16>, vector<8x128xf32> -> vector<8x128xf32>
    %c0_8 = arith.constant 0 : index
    %c0_9 = arith.constant 0 : index
    %59 = vector.load %arg4[%c0_8, %c0_9] : memref<1x128xf32, #tpu.memory_space<vmem>>, vector<1x128xf32>
    %60 = vector.broadcast %59 : vector<1x128xf32> to vector<8x128xf32>
    %61 = arith.addf %58, %60 : vector<8x128xf32>
    %cst_10 = arith.constant 0.000000e+00 : f32
    %62 = vector.broadcast %cst_10 : f32 to vector<8x128xf32>
    %63 = arith.maximumf %61, %62 : vector<8x128xf32>
    %64 = arith.truncf %63 : vector<8x128xf32> to vector<8x128xbf16>
    %c0_11 = arith.constant 0 : index
    %c0_12 = arith.constant 0 : index
    %65 = vector.load %arg5[%c0_11, %c0_12] : memref<128x128xbf16, #tpu.memory_space<vmem>>, vector<128x128xbf16>
    %cst_13 = arith.constant dense<0.000000e+00> : vector<8x128xf32>
    %66 = tpu.matmul %64, %65, %cst_13 {dimension_numbers = #tpu.dot_dimension_numbers<[1], [0], [0], [1], [0, 0, 1, 1], [], []>} : vector<8x128xbf16>, vector<128x128xbf16>, vector<8x128xf32> -> vector<8x128xf32>
    %c0_14 = arith.constant 0 : index
    %c0_15 = arith.constant 0 : index
    %67 = vector.load %arg6[%c0_14, %c0_15] : memref<1x128xf32, #tpu.memory_space<vmem>>, vector<1x128xf32>
    %68 = vector.broadcast %67 : vector<1x128xf32> to vector<8x128xf32>
    %69 = arith.addf %66, %68 : vector<8x128xf32>
    %c0_16 = arith.constant 0 : index
    %c0_17 = arith.constant 0 : index
    %70 = vector.load %arg7[%c0_16, %c0_17] : memref<8x128xf32, #tpu.memory_space<vmem>>, vector<8x128xf32>
    tpu.vector_store %arg7[%c0_16, %c0_17], %69 {strides = array<i32>} : memref<8x128xf32, #tpu.memory_space<vmem>>, vector<8x128xf32>,
    return
  }
  func.func @transform_0(%arg0: i32) -> (i32, i32) {
    %c0_i32 = arith.constant 0 : i32
    %c0_i32_0 = arith.constant 0 : i32
    return %arg0, %c0_i32 : i32, i32
  }
  func.func @transform_1(%arg0: i32) -> (i32, i32) {
    %c0_i32 = arith.constant 0 : i32
    %c0_i32_0 = arith.constant 0 : i32
    %c0_i32_1 = arith.constant 0 : i32
    return %c0_i32, %c0_i32_0 : i32, i32
  }
  func.func @transform_2(%arg0: i32) -> (i32, i32) {
    %c0_i32 = arith.constant 0 : i32
    %c0_i32_0 = arith.constant 0 : i32
    %c0_i32_1 = arith.constant 0 : i32
    return %c0_i32, %c0_i32_0 : i32, i32
  }
  func.func @transform_3(%arg0: i32) -> (i32, i32) {
    %c0_i32 = arith.constant 0 : i32
    %c0_i32_0 = arith.constant 0 : i32
    %c0_i32_1 = arith.constant 0 : i32
    return %c0_i32, %c0_i32_0 : i32, i32
  }
  func.func @transform_4(%arg0: i32) -> (i32, i32) {
    %c0_i32 = arith.constant 0 : i32
    %c0_i32_0 = arith.constant 0 : i32
    %c0_i32_1 = arith.constant 0 : i32
    return %c0_i32, %c0_i32_0 : i32, i32
  }
  func.func @transform_5(%arg0: i32) -> (i32, i32) {
    %c0_i32 = arith.constant 0 : i32
    %c0_i32_0 = arith.constant 0 : i32
    %c0_i32_1 = arith.constant 0 : i32
    return %c0_i32, %c0_i32_0 : i32, i32
  }
  func.func @transform_6(%arg0: i32) -> (i32, i32) {
    %c0_i32 = arith.constant 0 : i32
    %c0_i32_0 = arith.constant 0 : i32
    return %arg0, %c0_i32 : i32, i32
  }
}

</mosaic_0001>

<bundles_post_ra>
// kernel: forward.1
= control target key start
LH: loop header
LB: loop body
LE: loop exit
PB: predicated region body
PF: predicated region fallthrough
CT: control target
= control target key end

     0   :  { %11 = vsyncpa [#allocation3], 0  ;;  %s853_s0 = inlined_call_operand.vmem [shape: s32[8,8], index: 0, kind: input, shape index: {}]   ;;  %s854_s1 = inlined_call_operand.hbm [shape: bf16[128,128], index: 1, kind: input, shape index: {}]   ;;  %s855_s2 = inlined_call_operand.hbm [shape: bf16[128,128], index: 2, kind: input, shape index: {}]   ;;  %s856_s3 = inlined_call_operand.vmem [shape: f32[1,128], index: 3, kind: input, shape index: {}]   ;;  %s857_s4 = inlined_call_operand.hbm [shape: bf16[128,128], index: 4, kind: input, shape index: {}]   ;;  %s858_s5 = inlined_call_operand.vmem [shape: f32[1,128], index: 5, kind: input, shape index: {}]   ;;  %s859_s6 = inlined_call_operand.vmem [shape: f32[8,128], index: 6, kind: output, shape index: {}]  }
   0x1   :  { %12 = vsyncpa [#allocation5], 0  ;;  %s701_s21 = smov [#allocation4]   ;;  %s702_s23 = smov [#allocation2]  }
   0x2   :  { %s32_s22 = sshll.u32 %s701_s21, 4  ;;  %s20_s24 = sshll.u32 %s702_s23, 4  ;;  %s33_s22 = int_to_ptr.vmem [resolvable:$true] %s32_s22  ;;  %s751_s24 = int_to_ptr.vmem [resolvable:$true] %s20_s24 }
   0x3   :  { %s631_s27 = scalar_lea.hbm %s855_s2, 1024 }
   0x4   :  { %p632_p0 = scmp.ne.s32.totalorder %s855_s2, %s631_s27  ;;  %p635_p1 = scmp.lt.u32.totalorder %s631_s27, %s855_s2 }
   0x6   :  { %p637_p2 = pnand %p635_p1, %p632_p0 }
   0x8   :  { %640 = shalt.err (!%p637_p2)
}
   0x9   :  { %s641_s8 = scalar_lea.vmem %s33_s22, 1024  ;;  %p646_p4 = scmp.lt.s32.totalorder %s33_s22, %s33_s22 }
   0xa   :  { %p642_p3 = scmp.ne.s32.totalorder %s33_s22, %s641_s8  ;;  %p647_p5 = scmp.lt.s32.totalorder %s641_s8, %s641_s8 }
   0xc   :  { %p648_p6 = por %p647_p5, %p646_p4 }
   0xe   :  { %p649_p7 = pnand %p648_p6, %p642_p3 }
  0x10   :  { %652 = shalt.err (!%p649_p7)
}
  0x11   :  { %s703_s9 = smov 64   ;;  %s704_s10 = smov 4  }
  0x12   :  { %38 = dma.hbm_to_vmem [thread:$0]  %s855_s2, 1024, %s33_s22, [#allocation5], %s703_s9, %s703_s9, %s704_s10  }
  0x13   :  { %s653_s15 = scalar_lea.hbm %s854_s1, 1024 }
  0x14   :  { %p654_p8 = scmp.ne.s32.totalorder %s854_s1, %s653_s15  ;;  %p657_p9 = scmp.lt.u32.totalorder %s653_s15, %s854_s1 }
  0x16   :  { %p659_p10 = pnand %p657_p9, %p654_p8 }
  0x18   :  { %662 = shalt.err (!%p659_p10)
}
  0x19   :  { %s663_s20 = scalar_lea.vmem %s751_s24, 1024  ;;  %p668_p12 = scmp.lt.s32.totalorder %s751_s24, %s751_s24 }
  0x1a   :  { %p664_p11 = scmp.ne.s32.totalorder %s751_s24, %s663_s20  ;;  %p669_p13 = scmp.lt.s32.totalorder %s663_s20, %s663_s20 }
  0x1c   :  { %p670_p0 = por %p669_p13, %p668_p12 }
  0x1e   :  { %p671_p1 = pnand %p670_p0, %p664_p11 }
  0x20   :  { %674 = shalt.err (!%p671_p1)
}
  0x21   :  { %26 = dma.hbm_to_vmem [thread:$0]  %s854_s1, 1024, %s751_s24, [#allocation3], %s703_s9, %s703_s9, %s704_s10  }
  0x22   :  { %s705_s22 = smov [#allocation6]   ;;  %s675_s27 = scalar_lea.hbm %s857_s4, 1024 }
  0x23   :  { %s46_s23 = sshll.u32 %s705_s22, 4  ;;  %p676_p2 = scmp.ne.s32.totalorder %s857_s4, %s675_s27  ;;  %s47_s23 = int_to_ptr.vmem [resolvable:$true] %s46_s23 }
  0x24   :  { %p679_p3 = scmp.lt.u32.totalorder %s675_s27, %s857_s4 }
  0x26   :  { %p681_p4 = pnand %p679_p3, %p676_p2 }
  0x28   :  { %684 = shalt.err (!%p681_p4)
}
  0x29   :  { %s685_s8 = scalar_lea.vmem %s47_s23, 1024  ;;  %p690_p6 = scmp.lt.s32.totalorder %s47_s23, %s47_s23 }
  0x2a   :  { %p686_p5 = scmp.ne.s32.totalorder %s47_s23, %s685_s8  ;;  %p691_p7 = scmp.lt.s32.totalorder %s685_s8, %s685_s8 }
  0x2c   :  { %p692_p8 = por %p691_p7, %p690_p6 }
  0x2e   :  { %p693_p9 = pnand %p692_p8, %p686_p5 }
  0x30   :  { %696 = shalt.err (!%p693_p9)
}
  0x31   :  { %52 = dma.hbm_to_vmem [thread:$0]  %s857_s4, 1024, %s47_s23, [#allocation5], %s703_s9, %s703_s9, %s704_s10  }
  0x32   :  { %697 = dma.done.wait [#allocation3], 1024  }
  0x33   :  { %698 = vsyncadd [#allocation3], 4294966272 }
  0x34   :  { %699 = dma.done.wait [#allocation5], 2048  }
  0x35   :  { %700 = vsyncadd [#allocation5], 4294965248  ;;  %v706_v0 = vmov 2   ;;  %v707_v1 = vmov 0   ;;  %v708_v2 = vmov 0.0   ;;  %v65_v3 = vld [vmem:[%s853_s0] sm:$0xff]  ;;  %v66_v25 = vlaneseq }
  0x36   :  { %600 = vset.pattern.permute.xlu1 %v706_v0  ;;  %598 = vset.pattern.permute.xlu0 %v707_v1  ;;  %v607_v4 = vld [vmem:[#allocation2] sm:$0xff]   ;;  %v608_v5 = vld [vmem:[#allocation2 + $0x8] sm:$0xff]   ;;  %v709_v6 = vmov 3   ;;  %v710_v7 = vmov 1   ;;  %v609_v8 = vld [vmem:[#allocation2 + $0x10] sm:$0xff]   ;;  %v711_v9 = vmov 4  }
  0x37   :  { %523 = vmatprep.subr.bf16.mxu0 %v708_v2  ;;  %543 = vmatprep.subr.bf16.mxu1 %v708_v2  ;;  %v712_v10 = vmov 5   ;;  %v610_v11 = vld [vmem:[#allocation2 + $0x18] sm:$0xff]   ;;  %v611_v12 = vld [vmem:[#allocation2 + $0x20] sm:$0xff]   ;;  %v713_v13 = vmov 6   ;;  %v714_v14 = vmov 7   ;;  %v612_v15 = vld [vmem:[#allocation2 + $0x28] sm:$0xff]  }
  0x38   :  { %83 = vperm.xlu1 %600, %v65_v3   ;;  %69 = vperm.xlu0 %598, %v65_v3   ;;  %v613_v16 = vld [vmem:[#allocation2 + $0x30] sm:$0xff]   ;;  %vm715_vm0 = vmmov 0   ;;  %v615_v17 = vld [vmem:[#allocation4] sm:$0xff]   ;;  %v614_v18 = vld [vmem:[#allocation2 + $0x38] sm:$0xff]   ;;  %v67_v28 = vand.u32 127, %v66_v25 }
  0x39   :  { %524 = vmatpush3.bf16.msra.mxu0 %v607_v4  ;;  %539 = vmatprep.mubr.msk.bf16.mxu0 %vm715_vm0, %v708_v2  ;;  %v616_v19 = vld [vmem:[#allocation4 + $0x8] sm:$0xff]   ;;  %v617_v20 = vld [vmem:[#allocation4 + $0x10] sm:$0xff]   ;;  %v618_v21 = vld [vmem:[#allocation4 + $0x18] sm:$0xff]  }
  0x3a   :  { %525 = vmatprep.subr.bf16.mxu0 %v708_v2  ;;  %559 = vmatprep.mubr.msk.bf16.mxu1 %vm715_vm0, %v708_v2  ;;  %v619_v22 = vld [vmem:[#allocation4 + $0x20] sm:$0xff]   ;;  %v620_v23 = vld [vmem:[#allocation4 + $0x28] sm:$0xff]   ;;  %v621_v24 = vld [vmem:[#allocation4 + $0x30] sm:$0xff]  }
  0x3b   :  { %544 = vmatpush3.bf16.msra.mxu1 %v615_v17  ;;  %v622_v51 = vld [vmem:[#allocation4 + $0x38] sm:$0xff]   ;;  %v623_v52 = vld [vmem:[#allocation6] sm:$0xff]   ;;  %v624_v53 = vld [vmem:[#allocation6 + $0x8] sm:$0xff]  }
  0x3c   :  { %601 = vset.pattern.permute.xlu1 %v709_v6  ;;  %599 = vset.pattern.permute.xlu0 %v710_v7  ;;  %v625_v54 = vld [vmem:[#allocation6 + $0x10] sm:$0xff]   ;;  %v626_v55 = vld [vmem:[#allocation6 + $0x18] sm:$0xff]   ;;  %v627_v56 = vld [vmem:[#allocation6 + $0x20] sm:$0xff]  }
  0x3d   :  { %90 = vperm.xlu1 %601, %v65_v3   ;;  %76 = vperm.xlu0 %599, %v65_v3   ;;  %v628_v57 = vld [vmem:[#allocation6 + $0x28] sm:$0xff]   ;;  %v629_v0 = vld [vmem:[#allocation6 + $0x30] sm:$0xff]   ;;  %v630_v1 = vld [vmem:[#allocation6 + $0x38] sm:$0xff]  }
  0x3e   :  { %526 = vmatpush3.bf16.msra.mxu0 %v608_v5  ;;  %545 = vmatprep.subr.bf16.mxu1 %v708_v2 }
  0x3f   :  { %527 = vmatprep.subr.bf16.mxu0 %v708_v2  ;;  %546 = vmatpush3.bf16.msra.mxu1 %v616_v19 }
  0x40   :  { %547 = vmatprep.subr.bf16.mxu1 %v708_v2 }
  0x41   :  { %602 = vset.pattern.permute.xlu1 %v711_v9  ;;  %603 = vset.pattern.permute.xlu0 %v712_v10 }
  0x42   :  { %97 = vperm.xlu1 %602, %v65_v3   ;;  %104 = vperm.xlu0 %603, %v65_v3  }
  0x43   :  { %528 = vmatpush3.bf16.msra.mxu0 %v609_v8  ;;  %548 = vmatpush3.bf16.msra.mxu1 %v617_v20 }
  0x44   :  { %529 = vmatprep.subr.bf16.mxu0 %v708_v2  ;;  %549 = vmatprep.subr.bf16.mxu1 %v708_v2 }
  0x46   :  { %604 = vset.pattern.permute.xlu1 %v713_v13  ;;  %606 = vset.pattern.permute.xlu0 %v714_v14 }
  0x47   :  { %111 = vperm.xlu1 %604, %v65_v3   ;;  %530 = vmatpush3.bf16.msra.mxu0 %v610_v11  ;;  %v487_v11 = vld [vmem:[%s858_s5] ss:$0 sm:$0xff] }
  0x48   :  { %531 = vmatprep.subr.bf16.mxu0 %v708_v2  ;;  %550 = vmatpush3.bf16.msra.mxu1 %v618_v21 }
  0x49   :  { %551 = vmatprep.subr.bf16.mxu1 %v708_v2 }
  0x4b   :  { %605 = vset.pattern.permute.xlu1 %v714_v14  ;;  %532 = vmatpush3.bf16.msra.mxu0 %v611_v12 }
  0x4c   :  { %118 = vperm.xlu1 %605, %v65_v3   ;;  %533 = vmatprep.subr.bf16.mxu0 %v708_v2  ;;  %v478_v3 = vld [vmem:[%s856_s3] ss:$0 sm:$0xff] }
  0x4d   :  { %552 = vmatpush3.bf16.msra.mxu1 %v619_v22 }
  0x4e   :  { %553 = vmatprep.subr.bf16.mxu1 %v708_v2 }
  0x4f   :  { %534 = vmatpush3.bf16.msra.mxu0 %v612_v15 }
  0x50   :  { %535 = vmatprep.subr.bf16.mxu0 %v708_v2 }
  0x51   :  { %554 = vmatpush3.bf16.msra.mxu1 %v620_v23 }
  0x52   :  { %555 = vmatprep.subr.bf16.mxu1 %v708_v2 }
  0x53   :  { %536 = vmatpush3.bf16.msra.mxu0 %v613_v16 }
  0x54   :  { %537 = vmatprep.subr.bf16.mxu0 %v708_v2 }
  0x55   :  { %556 = vmatpush3.bf16.msra.mxu1 %v621_v24 }
  0x56   :  { %557 = vmatprep.subr.bf16.mxu1 %v708_v2 }
  0x57   :  { %538 = vmatpush3.bf16.msra.mxu0 %v614_v18 }
  0x58   :  { %563 = vmatprep.subr.bf16.mxu0 %v708_v2 }
  0x59   :  { %558 = vmatpush3.bf16.msra.mxu1 %v622_v51 }
  0xb7   :  { %v84_v26 = vpop.permute.xlu1 %83  ;;  %v70_v27 = vpop.permute.xlu0 %69 }
  0xb8   :  { %vm71_vm1 = vcmp.eq.s32.totalorder %v67_v28, %v70_v27  ;;  %vm85_vm2 = vcmp.eq.s32.totalorder %v67_v28, %v84_v26 }
  0xb9   :  { %v462_v31 = vsel %vm71_vm1, 1.0, %v708_v2  ;;  %v464_v34 = vsel %vm85_vm2, 1.0, %v708_v2 }
  0xbc   :  { %v91_v29 = vpop.permute.xlu1 %90  ;;  %v77_v30 = vpop.permute.xlu0 %76 }
  0xbd   :  { %vm78_vm3 = vcmp.eq.s32.totalorder %v67_v28, %v77_v30  ;;  %vm92_vm4 = vcmp.eq.s32.totalorder %v67_v28, %v91_v29 }
  0xbe   :  { %v463_v32 = vsel %vm78_vm3, 1.0, %v708_v2  ;;  %v465_v38 = vsel %vm92_vm4, 1.0, %v708_v2 }
  0xbf   :  { %v81_v33 = vadd.f32 %v463_v32, %v462_v31 }
  0xc1   :  { %v88_v35 = vadd.f32 %v464_v34, %v81_v33  ;;  %v98_v36 = vpop.permute.xlu1 %97  ;;  %v105_v37 = vpop.permute.xlu0 %104 }
  0xc2   :  { %vm99_vm5 = vcmp.eq.s32.totalorder %v67_v28, %v98_v36  ;;  %vm106_vm6 = vcmp.eq.s32.totalorder %v67_v28, %v105_v37 }
  0xc3   :  { %v95_v39 = vadd.f32 %v465_v38, %v88_v35  ;;  %v466_v40 = vsel %vm99_vm5, 1.0, %v708_v2  ;;  %v467_v42 = vsel %vm106_vm6, 1.0, %v708_v2 }
  0xc5   :  { %v102_v41 = vadd.f32 %v466_v40, %v95_v39 }
  0xc6   :  { %v112_v43 = vpop.permute.xlu1 %111 }
  0xc7   :  { %vm113_vm7 = vcmp.eq.s32.totalorder %v67_v28, %v112_v43  ;;  %v109_v44 = vadd.f32 %v467_v42, %v102_v41 }
  0xc8   :  { %v468_v45 = vsel %vm113_vm7, 1.0, %v708_v2 }
  0xc9   :  { %v116_v47 = vadd.f32 %v468_v45, %v109_v44 }
  0xcb   :  { %v119_v46 = vpop.permute.xlu1 %118 }
  0xcc   :  { %vm120_vm8 = vcmp.eq.s32.totalorder %v67_v28, %v119_v46 }
  0xcd   :  { %v469_v48 = vsel %vm120_vm8, 1.0, %v708_v2 }
  0xce   :  { %v123_v49 = vadd.f32 %v469_v48, %v116_v47 }
  0xd0   :  { %v124_v50 = vpack.c.bf16 %v123_v49, %v123_v49 }
  0xd2   :  { %540 = vmatmul.mubr.bf16.vlgmr.msra.gmra.mrb[0].mxu0 %v124_v50 }
  0xd3   :  { %579 = vmatprep.mubr.msk.bf16.mxu0 %vm715_vm0, %v708_v2  ;;  %564 = vmatpush3.bf16.msra.mxu0 %v623_v52 }
  0xd4   :  { %565 = vmatprep.subr.bf16.mxu0 %v708_v2 }
  0xd7   :  { %566 = vmatpush3.bf16.msra.mxu0 %v624_v53 }
  0xd8   :  { %567 = vmatprep.subr.bf16.mxu0 %v708_v2 }
  0xdb   :  { %568 = vmatpush3.bf16.msra.mxu0 %v625_v54 }
  0xdc   :  { %569 = vmatprep.subr.bf16.mxu0 %v708_v2 }
  0xdf   :  { %570 = vmatpush3.bf16.msra.mxu0 %v626_v55 }
  0xe0   :  { %571 = vmatprep.subr.bf16.mxu0 %v708_v2 }
  0xe3   :  { %572 = vmatpush3.bf16.msra.mxu0 %v627_v56 }
  0xe4   :  { %573 = vmatprep.subr.bf16.mxu0 %v708_v2 }
  0xe7   :  { %574 = vmatpush3.bf16.msra.mxu0 %v628_v57 }
  0xe8   :  { %575 = vmatprep.subr.bf16.mxu0 %v708_v2 }
  0xeb   :  { %576 = vmatpush3.bf16.msra.mxu0 %v629_v0 }
  0xec   :  { %577 = vmatprep.subr.bf16.mxu0 %v708_v2 }
  0xef   :  { %578 = vmatpush3.bf16.msra.mxu0 %v630_v1 }
 0x1a5   :  { %v223_v58 = vpop.f32.mrb[0].mxu0 }
 0x1a6   :  { %v229_v59 = vmul.f32 0.125, %v223_v58  ;;  %v541_v60 = vpop.f32.mrb[1].mxu0 }
 0x1a7   :  { %v226_v61 = vpop.f32.mrb[2].mxu0 }
 0x1a8   :  { %v230_v62 = vpack.c.bf16 %v229_v59, %v229_v59  ;;  %v542_v63 = vpop.f32.mrb[3].mxu0 }
 0x1aa   :  { %560 = vmatmul.mubr.bf16.vlgmr.msra.gmra.mrb[0].mxu1 %v230_v62 }
 0x27d   :  { %v336_v4 = vpop.f32.mrb[0].mxu1 }
 0x27e   :  { %v337_v5 = vadd.f32 %v478_v3, %v336_v4  ;;  %v561_v6 = vpop.f32.mrb[1].mxu1 }
 0x27f   :  { %v339_v7 = vpop.f32.mrb[2].mxu1 }
 0x280   :  { %v342_v8 = vmax.f32 %v337_v5, 0.0  ;;  %v562_v9 = vpop.f32.mrb[3].mxu1 }
 0x282   :  { %v343_v10 = vpack.c.bf16 %v342_v8, %v342_v8 }
 0x284   :  { %580 = vmatmul.mubr.bf16.vlgmr.msra.gmra.mrb[4].mxu0 %v343_v10 }
 0x357   :  { %v449_v12 = vpop.f32.mrb[4].mxu0 }
 0x358   :  { %v450_v2 = vadd.f32 %v487_v11, %v449_v12  ;;  %v581_v13 = vpop.f32.mrb[5].mxu0 }
 0x359   :  { %v452_v14 = vpop.f32.mrb[6].mxu0 }
 0x35a   :  { %455 = vst [vmem:[%s859_s6] sm:$0xff] %v450_v2  ;;  %v582_v15 = vpop.f32.mrb[7].mxu0 }
 0x35b   :  { %460 = vsyncpa [#allocation3], 1 }
 0x35c   :  { %461 = vsyncpa [#allocation5], 1 }

// kernel: forward.1
= control target key start
LH: loop header
LB: loop body
LE: loop exit
PB: predicated region body
PF: predicated region fallthrough
CT: control target
= control target key end

     0   :  { %11 = vsyncpa [#allocation3], 0  ;;  %s853_s0 = inlined_call_operand.vmem [shape: s32[8,8], index: 0, kind: input, shape index: {}]   ;;  %s854_s1 = inlined_call_operand.hbm [shape: bf16[128,128], index: 1, kind: input, shape index: {}]   ;;  %s855_s2 = inlined_call_operand.hbm [shape: bf16[128,128], index: 2, kind: input, shape index: {}]   ;;  %s856_s3 = inlined_call_operand.vmem [shape: f32[1,128], index: 3, kind: input, shape index: {}]   ;;  %s857_s4 = inlined_call_operand.hbm [shape: bf16[128,128], index: 4, kind: input, shape index: {}]   ;;  %s858_s5 = inlined_call_operand.vmem [shape: f32[1,128], index: 5, kind: input, shape index: {}]   ;;  %s859_s6 = inlined_call_operand.vmem [shape: f32[8,128], index: 6, kind: output, shape index: {}]  }
   0x1   :  { %12 = vsyncpa [#allocation5], 0  ;;  %s701_s21 = smov [#allocation4]   ;;  %s702_s23 = smov [#allocation2]  }
   0x2   :  { %s32_s22 = sshll.u32 %s701_s21, 4  ;;  %s20_s24 = sshll.u32 %s702_s23, 4  ;;  %s33_s22 = int_to_ptr.vmem [resolvable:$true] %s32_s22  ;;  %s751_s24 = int_to_ptr.vmem [resolvable:$true] %s20_s24 }
   0x3   :  { %s631_s27 = scalar_lea.hbm %s855_s2, 1024 }
   0x4   :  { %p632_p0 = scmp.ne.s32.totalorder %s855_s2, %s631_s27  ;;  %p635_p1 = scmp.lt.u32.totalorder %s631_s27, %s855_s2 }
   0x6   :  { %p637_p2 = pnand %p635_p1, %p632_p0 }
   0x8   :  { %640 = shalt.err (!%p637_p2)
}
   0x9   :  { %s641_s8 = scalar_lea.vmem %s33_s22, 1024  ;;  %p646_p4 = scmp.lt.s32.totalorder %s33_s22, %s33_s22 }
   0xa   :  { %p642_p3 = scmp.ne.s32.totalorder %s33_s22, %s641_s8  ;;  %p647_p5 = scmp.lt.s32.totalorder %s641_s8, %s641_s8 }
   0xc   :  { %p648_p6 = por %p647_p5, %p646_p4 }
   0xe   :  { %p649_p7 = pnand %p648_p6, %p642_p3 }
  0x10   :  { %652 = shalt.err (!%p649_p7)
}
  0x11   :  { %s703_s9 = smov 64   ;;  %s704_s10 = smov 4  }
  0x12   :  { %38 = dma.hbm_to_vmem [thread:$0]  %s855_s2, 1024, %s33_s22, [#allocation5], %s703_s9, %s703_s9, %s704_s10  }
  0x13   :  { %s653_s15 = scalar_lea.hbm %s854_s1, 1024 }
  0x14   :  { %p654_p8 = scmp.ne.s32.totalorder %s854_s1, %s653_s15  ;;  %p657_p9 = scmp.lt.u32.totalorder %s653_s15, %s854_s1 }
  0x16   :  { %p659_p10 = pnand %p657_p9, %p654_p8 }
  0x18   :  { %662 = shalt.err (!%p659_p10)
}
  0x19   :  { %s663_s20 = scalar_lea.vmem %s751_s24, 1024  ;;  %p668_p12 = scmp.lt.s32.totalorder %s751_s24, %s751_s24 }
  0x1a   :  { %p664_p11 = scmp.ne.s32.totalorder %s751_s24, %s663_s20  ;;  %p669_p13 = scmp.lt.s32.totalorder %s663_s20, %s663_s20 }
  0x1c   :  { %p670_p0 = por %p669_p13, %p668_p12 }
  0x1e   :  { %p671_p1 = pnand %p670_p0, %p664_p11 }
  0x20   :  { %674 = shalt.err (!%p671_p1)
}
  0x21   :  { %26 = dma.hbm_to_vmem [thread:$0]  %s854_s1, 1024, %s751_s24, [#allocation3], %s703_s9, %s703_s9, %s704_s10  }
  0x22   :  { %s705_s22 = smov [#allocation6]   ;;  %s675_s27 = scalar_lea.hbm %s857_s4, 1024 }
  0x23   :  { %s46_s23 = sshll.u32 %s705_s22, 4  ;;  %p676_p2 = scmp.ne.s32.totalorder %s857_s4, %s675_s27  ;;  %s47_s23 = int_to_ptr.vmem [resolvable:$true] %s46_s23 }
  0x24   :  { %p679_p3 = scmp.lt.u32.totalorder %s675_s27, %s857_s4 }
  0x26   :  { %p681_p4 = pnand %p679_p3, %p676_p2 }
  0x28   :  { %684 = shalt.err (!%p681_p4)
}
  0x29   :  { %s685_s8 = scalar_lea.vmem %s47_s23, 1024  ;;  %p690_p6 = scmp.lt.s32.totalorder %s47_s23, %s47_s23 }
  0x2a   :  { %p686_p5 = scmp.ne.s32.totalorder %s47_s23, %s685_s8  ;;  %p691_p7 = scmp.lt.s32.totalorder %s685_s8, %s685_s8 }
  0x2c   :  { %p692_p8 = por %p691_p7, %p690_p6 }
  0x2e   :  { %p693_p9 = pnand %p692_p8, %p686_p5 }
  0x30   :  { %696 = shalt.err (!%p693_p9)
}
  0x31   :  { %52 = dma.hbm_to_vmem [thread:$0]  %s857_s4, 1024, %s47_s23, [#allocation5], %s703_s9, %s703_s9, %s704_s10  }
  0x32   :  { %697 = dma.done.wait [#allocation3], 1024  }
  0x33   :  { %698 = vsyncadd [#allocation3], 4294966272 }
  0x34   :  { %699 = dma.done.wait [#allocation5], 2048  }
  0x35   :  { %700 = vsyncadd [#allocation5], 4294965248  ;;  %v706_v0 = vmov 2   ;;  %v707_v1 = vmov 0   ;;  %v708_v2 = vmov 0.0   ;;  %v65_v3 = vld [vmem:[%s853_s0] sm:$0xff]  ;;  %v66_v25 = vlaneseq }
  0x36   :  { %600 = vset.pattern.permute.xlu1 %v706_v0  ;;  %598 = vset.pattern.permute.xlu0 %v707_v1  ;;  %v607_v4 = vld [vmem:[#allocation2] sm:$0xff]   ;;  %v608_v5 = vld [vmem:[#allocation2 + $0x8] sm:$0xff]   ;;  %v709_v6 = vmov 3   ;;  %v710_v7 = vmov 1   ;;  %v609_v8 = vld [vmem:[#allocation2 + $0x10] sm:$0xff]   ;;  %v711_v9 = vmov 4  }
  0x37   :  { %523 = vmatprep.subr.bf16.mxu0 %v708_v2  ;;  %543 = vmatprep.subr.bf16.mxu1 %v708_v2  ;;  %v712_v10 = vmov 5   ;;  %v610_v11 = vld [vmem:[#allocation2 + $0x18] sm:$0xff]   ;;  %v611_v12 = vld [vmem:[#allocation2 + $0x20] sm:$0xff]   ;;  %v713_v13 = vmov 6   ;;  %v714_v14 = vmov 7   ;;  %v612_v15 = vld [vmem:[#allocation2 + $0x28] sm:$0xff]  }
  0x38   :  { %83 = vperm.xlu1 %600, %v65_v3   ;;  %69 = vperm.xlu0 %598, %v65_v3   ;;  %v613_v16 = vld [vmem:[#allocation2 + $0x30] sm:$0xff]   ;;  %vm715_vm0 = vmmov 0   ;;  %v615_v17 = vld [vmem:[#allocation4] sm:$0xff]   ;;  %v614_v18 = vld [vmem:[#allocation2 + $0x38] sm:$0xff]   ;;  %v67_v28 = vand.u32 127, %v66_v25 }
  0x39   :  { %524 = vmatpush3.bf16.msra.mxu0 %v607_v4  ;;  %539 = vmatprep.mubr.msk.bf16.mxu0 %vm715_vm0, %v708_v2  ;;  %v616_v19 = vld [vmem:[#allocation4 + $0x8] sm:$0xff]   ;;  %v617_v20 = vld [vmem:[#allocation4 + $0x10] sm:$0xff]   ;;  %v618_v21 = vld [vmem:[#allocation4 + $0x18] sm:$0xff]  }
  0x3a   :  { %525 = vmatprep.subr.bf16.mxu0 %v708_v2  ;;  %559 = vmatprep.mubr.msk.bf16.mxu1 %vm715_vm0, %v708_v2  ;;  %v619_v22 = vld [vmem:[#allocation4 + $0x20] sm:$0xff]   ;;  %v620_v23 = vld [vmem:[#allocation4 + $0x28] sm:$0xff]   ;;  %v621_v24 = vld [vmem:[#allocation4 + $0x30] sm:$0xff]  }
  0x3b   :  { %544 = vmatpush3.bf16.msra.mxu1 %v615_v17  ;;  %v622_v51 = vld [vmem:[#allocation4 + $0x38] sm:$0xff]   ;;  %v623_v52 = vld [vmem:[#allocation6] sm:$0xff]   ;;  %v624_v53 = vld [vmem:[#allocation6 + $0x8] sm:$0xff]  }
  0x3c   :  { %601 = vset.pattern.permute.xlu1 %v709_v6  ;;  %599 = vset.pattern.permute.xlu0 %v710_v7  ;;  %v625_v54 = vld [vmem:[#allocation6 + $0x10] sm:$0xff]   ;;  %v626_v55 = vld [vmem:[#allocation6 + $0x18] sm:$0xff]   ;;  %v627_v56 = vld [vmem:[#allocation6 + $0x20] sm:$0xff]  }
  0x3d   :  { %90 = vperm.xlu1 %601, %v65_v3   ;;  %76 = vperm.xlu0 %599, %v65_v3   ;;  %v628_v57 = vld [vmem:[#allocation6 + $0x28] sm:$0xff]   ;;  %v629_v0 = vld [vmem:[#allocation6 + $0x30] sm:$0xff]   ;;  %v630_v1 = vld [vmem:[#allocation6 + $0x38] sm:$0xff]  }
  0x3e   :  { %526 = vmatpush3.bf16.msra.mxu0 %v608_v5  ;;  %545 = vmatprep.subr.bf16.mxu1 %v708_v2 }
  0x3f   :  { %527 = vmatprep.subr.bf16.mxu0 %v708_v2  ;;  %546 = vmatpush3.bf16.msra.mxu1 %v616_v19 }
  0x40   :  { %547 = vmatprep.subr.bf16.mxu1 %v708_v2 }
  0x41   :  { %602 = vset.pattern.permute.xlu1 %v711_v9  ;;  %603 = vset.pattern.permute.xlu0 %v712_v10 }
  0x42   :  { %97 = vperm.xlu1 %602, %v65_v3   ;;  %104 = vperm.xlu0 %603, %v65_v3  }
  0x43   :  { %528 = vmatpush3.bf16.msra.mxu0 %v609_v8  ;;  %548 = vmatpush3.bf16.msra.mxu1 %v617_v20 }
  0x44   :  { %529 = vmatprep.subr.bf16.mxu0 %v708_v2  ;;  %549 = vmatprep.subr.bf16.mxu1 %v708_v2 }
  0x46   :  { %604 = vset.pattern.permute.xlu1 %v713_v13  ;;  %606 = vset.pattern.permute.xlu0 %v714_v14 }
  0x47   :  { %111 = vperm.xlu1 %604, %v65_v3   ;;  %530 = vmatpush3.bf16.msra.mxu0 %v610_v11  ;;  %v487_v11 = vld [vmem:[%s858_s5] ss:$0 sm:$0xff] }
  0x48   :  { %531 = vmatprep.subr.bf16.mxu0 %v708_v2  ;;  %550 = vmatpush3.bf16.msra.mxu1 %v618_v21 }
  0x49   :  { %551 = vmatprep.subr.bf16.mxu1 %v708_v2 }
  0x4b   :  { %605 = vset.pattern.permute.xlu1 %v714_v14  ;;  %532 = vmatpush3.bf16.msra.mxu0 %v611_v12 }
  0x4c   :  { %118 = vperm.xlu1 %605, %v65_v3   ;;  %533 = vmatprep.subr.bf16.mxu0 %v708_v2  ;;  %v478_v3 = vld [vmem:[%s856_s3] ss:$0 sm:$0xff] }
  0x4d   :  { %552 = vmatpush3.bf16.msra.mxu1 %v619_v22 }
  0x4e   :  { %553 = vmatprep.subr.bf16.mxu1 %v708_v2 }
  0x4f   :  { %534 = vmatpush3.bf16.msra.mxu0 %v612_v15 }
  0x50   :  { %535 = vmatprep.subr.bf16.mxu0 %v708_v2 }
  0x51   :  { %554 = vmatpush3.bf16.msra.mxu1 %v620_v23 }
  0x52   :  { %555 = vmatprep.subr.bf16.mxu1 %v708_v2 }
  0x53   :  { %536 = vmatpush3.bf16.msra.mxu0 %v613_v16 }
  0x54   :  { %537 = vmatprep.subr.bf16.mxu0 %v708_v2 }
  0x55   :  { %556 = vmatpush3.bf16.msra.mxu1 %v621_v24 }
  0x56   :  { %557 = vmatprep.subr.bf16.mxu1 %v708_v2 }
  0x57   :  { %538 = vmatpush3.bf16.msra.mxu0 %v614_v18 }
  0x58   :  { %563 = vmatprep.subr.bf16.mxu0 %v708_v2 }
  0x59   :  { %558 = vmatpush3.bf16.msra.mxu1 %v622_v51 }
  0xb7   :  { %v84_v26 = vpop.permute.xlu1 %83  ;;  %v70_v27 = vpop.permute.xlu0 %69 }
  0xb8   :  { %vm71_vm1 = vcmp.eq.s32.totalorder %v67_v28, %v70_v27  ;;  %vm85_vm2 = vcmp.eq.s32.totalorder %v67_v28, %v84_v26 }
  0xb9   :  { %v462_v31 = vsel %vm71_vm1, 1.0, %v708_v2  ;;  %v464_v34 = vsel %vm85_vm2, 1.0, %v708_v2 }
  0xbc   :  { %v91_v29 = vpop.permute.xlu1 %90  ;;  %v77_v30 = vpop.permute.xlu0 %76 }
  0xbd   :  { %vm78_vm3 = vcmp.eq.s32.totalorder %v67_v28, %v77_v30  ;;  %vm92_vm4 = vcmp.eq.s32.totalorder %v67_v28, %v91_v29 }
  0xbe   :  { %v463_v32 = vsel %vm78_vm3, 1.0, %v708_v2  ;;  %v465_v38 = vsel %vm92_vm4, 1.0, %v708_v2 }
  0xbf   :  { %v81_v33 = vadd.f32 %v463_v32, %v462_v31 }
  0xc1   :  { %v88_v35 = vadd.f32 %v464_v34, %v81_v33  ;;  %v98_v36 = vpop.permute.xlu1 %97  ;;  %v105_v37 = vpop.permute.xlu0 %104 }
  0xc2   :  { %vm99_vm5 = vcmp.eq.s32.totalorder %v67_v28, %v98_v36  ;;  %vm106_vm6 = vcmp.eq.s32.totalorder %v67_v28, %v105_v37 }
  0xc3   :  { %v95_v39 = vadd.f32 %v465_v38, %v88_v35  ;;  %v466_v40 = vsel %vm99_vm5, 1.0, %v708_v2  ;;  %v467_v42 = vsel %vm106_vm6, 1.0, %v708_v2 }
  0xc5   :  { %v102_v41 = vadd.f32 %v466_v40, %v95_v39 }
  0xc6   :  { %v112_v43 = vpop.permute.xlu1 %111 }
  0xc7   :  { %vm113_vm7 = vcmp.eq.s32.totalorder %v67_v28, %v112_v43  ;;  %v109_v44 = vadd.f32 %v467_v42, %v102_v41 }
  0xc8   :  { %v468_v45 = vsel %vm113_vm7, 1.0, %v708_v2 }
  0xc9   :  { %v116_v47 = vadd.f32 %v468_v45, %v109_v44 }
  0xcb   :  { %v119_v46 = vpop.permute.xlu1 %118 }
  0xcc   :  { %vm120_vm8 = vcmp.eq.s32.totalorder %v67_v28, %v119_v46 }
  0xcd   :  { %v469_v48 = vsel %vm120_vm8, 1.0, %v708_v2 }
  0xce   :  { %v123_v49 = vadd.f32 %v469_v48, %v116_v47 }
  0xd0   :  { %v124_v50 = vpack.c.bf16 %v123_v49, %v123_v49 }
  0xd2   :  { %540 = vmatmul.mubr.bf16.vlgmr.msra.gmra.mrb[0].mxu0 %v124_v50 }
  0xd3   :  { %579 = vmatprep.mubr.msk.bf16.mxu0 %vm715_vm0, %v708_v2  ;;  %564 = vmatpush3.bf16.msra.mxu0 %v623_v52 }
  0xd4   :  { %565 = vmatprep.subr.bf16.mxu0 %v708_v2 }
  0xd7   :  { %566 = vmatpush3.bf16.msra.mxu0 %v624_v53 }
  0xd8   :  { %567 = vmatprep.subr.bf16.mxu0 %v708_v2 }
  0xdb   :  { %568 = vmatpush3.bf16.msra.mxu0 %v625_v54 }
  0xdc   :  { %569 = vmatprep.subr.bf16.mxu0 %v708_v2 }
  0xdf   :  { %570 = vmatpush3.bf16.msra.mxu0 %v626_v55 }
  0xe0   :  { %571 = vmatprep.subr.bf16.mxu0 %v708_v2 }
  0xe3   :  { %572 = vmatpush3.bf16.msra.mxu0 %v627_v56 }
  0xe4   :  { %573 = vmatprep.subr.bf16.mxu0 %v708_v2 }
  0xe7   :  { %574 = vmatpush3.bf16.msra.mxu0 %v628_v57 }
  0xe8   :  { %575 = vmatprep.subr.bf16.mxu0 %v708_v2 }
  0xeb   :  { %576 = vmatpush3.bf16.msra.mxu0 %v629_v0 }
  0xec   :  { %577 = vmatprep.subr.bf16.mxu0 %v708_v2 }
  0xef   :  { %578 = vmatpush3.bf16.msra.mxu0 %v630_v1 }
 0x1a5   :  { %v223_v58 = vpop.f32.mrb[0].mxu0 }
 0x1a6   :  { %v229_v59 = vmul.f32 0.125, %v223_v58  ;;  %v541_v60 = vpop.f32.mrb[1].mxu0 }
 0x1a7   :  { %v226_v61 = vpop.f32.mrb[2].mxu0 }
 0x1a8   :  { %v230_v62 = vpack.c.bf16 %v229_v59, %v229_v59  ;;  %v542_v63 = vpop.f32.mrb[3].mxu0 }
 0x1aa   :  { %560 = vmatmul.mubr.bf16.vlgmr.msra.gmra.mrb[0].mxu1 %v230_v62 }
 0x27d   :  { %v336_v4 = vpop.f32.mrb[0].mxu1 }
 0x27e   :  { %v337_v5 = vadd.f32 %v478_v3, %v336_v4  ;;  %v561_v6 = vpop.f32.mrb[1].mxu1 }
 0x27f   :  { %v339_v7 = vpop.f32.mrb[2].mxu1 }
 0x280   :  { %v342_v8 = vmax.f32 %v337_v5, 0.0  ;;  %v562_v9 = vpop.f32.mrb[3].mxu1 }
 0x282   :  { %v343_v10 = vpack.c.bf16 %v342_v8, %v342_v8 }
 0x284   :  { %580 = vmatmul.mubr.bf16.vlgmr.msra.gmra.mrb[4].mxu0 %v343_v10 }
 0x357   :  { %v449_v12 = vpop.f32.mrb[4].mxu0 }
 0x358   :  { %v450_v2 = vadd.f32 %v487_v11, %v449_v12  ;;  %v581_v13 = vpop.f32.mrb[5].mxu0 }
 0x359   :  { %v452_v14 = vpop.f32.mrb[6].mxu0 }
 0x35a   :  { %455 = vst [vmem:[%s859_s6] sm:$0xff] %v450_v2  ;;  %v582_v15 = vpop.f32.mrb[7].mxu0 }
 0x35b   :  { %460 = vsyncpa [#allocation3], 1 }
 0x35c   :  { %461 = vsyncpa [#allocation5], 1 }

</bundles_post_ra>
